<compile_context>
chip_gen: v6e
topology: v6e:2x2x1
jax: 0.10.0
libtpu: 0.0.40
codegen_flags: <defaults>
</compile_context>

<pallas_src>
import jax
import jax.numpy as jnp
from jax.experimental import pallas as pl
from jax.experimental.pallas import tpu as pltpu

HIDDEN = 128   # fixed by the module definition


def _round_up(x, m):
    return ((x + m - 1) // m) * m


def dqn_kernel(x_ref, w1_ref, w2_ref, w3_ref, b_ref, o_ref):
    out_dim = o_ref.shape[-1]
    # fc1 + relu : bf16 MXU matmul, f32 accumulate, f32 epilogue on the VPU.
    x = x_ref[...]
    if x.dtype != jnp.bfloat16:
        x = x.astype(jnp.bfloat16)          # no-op when the producer emits bf16
    h1 = jnp.dot(x, w1_ref[...], preferred_element_type=jnp.float32)
    h1 = jnp.maximum(h1 + b_ref[0:1, :HIDDEN], 0.0)
    # fc2 + relu
    h2 = jnp.dot(h1.astype(jnp.bfloat16), w2_ref[...],
                 preferred_element_type=jnp.float32)
    h2 = jnp.maximum(h2 + b_ref[1:2, :HIDDEN], 0.0)
    # fc3 (no activation) -> narrow (tb, out_dim) store; no lane padding.
    out = jnp.dot(h2.astype(jnp.bfloat16), w3_ref[...],
                  preferred_element_type=jnp.float32)
    o_ref[...] = (out + b_ref[2:3, :out_dim]).astype(o_ref.dtype)


def prepare_params(params):
    """One-time packing: (w1,b1,w2,b2,w3,b3) -> (w1, w2, w3, bias_slab).

    The three biases are packed into a single (3, max(HIDDEN, out_dim)) f32
    slab (one DMA instead of three).  Call once; reuse the result every step.
    """
    w1, b1, w2, b2, w3, b3 = params
    out_dim = w3.shape[1]
    width = max(HIDDEN, out_dim)
    bias = jnp.zeros((3, width), jnp.float32)
    bias = bias.at[0, :HIDDEN].set(b1.reshape(-1).astype(jnp.float32))
    bias = bias.at[1, :HIDDEN].set(b2.reshape(-1).astype(jnp.float32))
    bias = bias.at[2, :out_dim].set(b3.reshape(-1).astype(jnp.float32))
    return (w1, w2, w3, bias)


def dqn_forward(x, prepared, *, block_b=2048):
    """Fused DQN forward. x: (B, in_dim) f32 or bf16. Returns (B, out_dim) f32."""
    w1, w2, w3, bias = prepared
    B, in_dim = x.shape
    out_dim = w3.shape[1]

    # Batch tile: big enough to amortize per-step overhead, but guaranteeing
    # >= 2 grid steps when B > 8 so both v7x TensorCores get work.
    if B <= 8:
        tb = B
    else:
        tb = min(block_b, _round_up(-(-B // 2), 8))
    grid = (pl.cdiv(B, tb),)

    flops = 2 * B * (in_dim * HIDDEN + HIDDEN * HIDDEN + HIDDEN * out_dim)
    bytes_accessed = (x.size * x.dtype.itemsize
                      + w1.size * w1.dtype.itemsize
                      + w2.size * w2.dtype.itemsize
                      + w3.size * w3.dtype.itemsize
                      + bias.size * 4
                      + B * out_dim * 4)

    const = lambda shape: pl.BlockSpec(shape, lambda i: (0, 0))
    out = pl.pallas_call(
        dqn_kernel,
        out_shape=jax.ShapeDtypeStruct((B, out_dim), jnp.float32),
        grid=grid,
        in_specs=[
            pl.BlockSpec((tb, in_dim), lambda i: (i, 0)),   # x: tiled over batch
            const(w1.shape),                                # weights/bias: VMEM-resident
            const(w2.shape),
            const(w3.shape),
            const(bias.shape),
        ],
        out_specs=pl.BlockSpec((tb, out_dim), lambda i: (i, 0)),
        compiler_params=pltpu.CompilerParams(
            dimension_semantics=("parallel",),
            # Covers tb up to ~4096 everywhere: above v5e's 16 MiB scoped
            # default, below v7x's 64 MiB/TC physical VMEM.
            vmem_limit_bytes=28 * 1024 * 1024),
        cost_estimate=pl.CostEstimate(
            flops=flops, transcendentals=0, bytes_accessed=bytes_accessed),
    )(x, w1, w2, w3, bias)
    return out


def init_dqn_params(key, input_dim, output_dim, weight_dtype=jnp.bfloat16):
    """nn.Linear-style init (U[-1/sqrt(fan_in), +1/sqrt(fan_in)]).
    Weights in bf16 (MXU-native), biases kept f32 for the f32 epilogue."""
    keys = jax.random.split(key, 6)
    def linear(kw, kb, fan_in, fan_out):
        bound = 1.0 / jnp.sqrt(jnp.float32(fan_in))
        w = jax.random.uniform(kw, (fan_in, fan_out), jnp.float32,
                               -bound, bound).astype(weight_dtype)
        b = jax.random.uniform(kb, (1, fan_out), jnp.float32, -bound, bound)
        return w, b
    w1, b1 = linear(keys[0], keys[1], input_dim, HIDDEN)
    w2, b2 = linear(keys[2], keys[3], HIDDEN, HIDDEN)
    w3, b3 = linear(keys[4], keys[5], HIDDEN, output_dim)
    return (w1, b1, w2, b2, w3, b3)


def _ref_forward(x, params):
    """Pure-JAX reference mirroring the kernel's bf16-matmul / f32-epilogue math."""
    w1, b1, w2, b2, w3, b3 = params
    h = jnp.dot(x.astype(jnp.bfloat16), w1, preferred_element_type=jnp.float32) + b1
    h = jnp.maximum(h, 0.0)
    h = jnp.dot(h.astype(jnp.bfloat16), w2, preferred_element_type=jnp.float32) + b2
    h = jnp.maximum(h, 0.0)
    return jnp.dot(h.astype(jnp.bfloat16), w3, preferred_element_type=jnp.float32) + b3


if __name__ == "__main__":
    key = jax.random.PRNGKey(0)
    k_param, k_x1, k_x2 = jax.random.split(key, 3)

    input_dim = 16   # game-state feature vector
    output_dim = 8   # number of discrete actions
    params = init_dqn_params(k_param, input_dim, output_dim)
    prepared = prepare_params(params)   # one-time bias packing

    # Small primary check (batch=2, single grid step).
    x = jax.random.normal(k_x1, (2, input_dim), jnp.float32)
    out = jax.block_until_ready(dqn_forward(x, prepared))
    ref = _ref_forward(x, params)
    assert out.shape == (2, output_dim)
    assert jnp.allclose(out, ref, atol=2e-2, rtol=2e-2)

    # Multi-step grid (>=2 parallel steps) + ragged last tile path.
    x2 = jax.random.normal(k_x2, (200, input_dim), jnp.float32)
    out2 = jax.block_until_ready(dqn_forward(x2, prepared))
    ref2 = _ref_forward(x2, params)
    assert out2.shape == (200, output_dim)
    assert jnp.allclose(out2, ref2, atol=2e-2, rtol=2e-2)

    print("KERNEL_OK")
</pallas_src>

<mosaic_0001>
module attributes {stable_mosaic.version = 11 : i64} {
  func.func @dqn_kernel(%arg0: i32, %arg1: memref<2x16xf32, #tpu.memory_space<vmem>>, %arg2: memref<16x128xbf16, #tpu.memory_space<vmem>>, %arg3: memref<128x128xbf16, #tpu.memory_space<vmem>>, %arg4: memref<128x8xbf16, #tpu.memory_space<vmem>>, %arg5: memref<3x128xf32, #tpu.memory_space<vmem>>, %arg6: memref<2x8xf32, #tpu.memory_space<vmem>>) attributes {dimension_semantics = [#tpu.dimension_semantics<parallel>], iteration_bounds = array<i64: 1>, scalar_prefetch = 0 : i64, scratch_operands = 0 : i64, tpu.core_type = #tpu.core_type<tc>, window_params = [{transform_indices = @transform_0, window_bounds = array<i64: 2, 16>}, {pipeline_mode = #tpu.pipeline_mode<synchronous>, transform_indices = @transform_1, window_bounds = array<i64: 16, 128>}, {pipeline_mode = #tpu.pipeline_mode<synchronous>, transform_indices = @transform_2, window_bounds = array<i64: 128, 128>}, {pipeline_mode = #tpu.pipeline_mode<synchronous>, transform_indices = @transform_3, window_bounds = array<i64: 128, 8>}, {pipeline_mode = #tpu.pipeline_mode<synchronous>, transform_indices = @transform_4, window_bounds = array<i64: 3, 128>}, {transform_indices = @transform_5, window_bounds = array<i64: 2, 8>}]} {
    %c0 = arith.constant 0 : index
    %c0_0 = arith.constant 0 : index
    %0 = vector.load %arg1[%c0, %c0_0] : memref<2x16xf32, #tpu.memory_space<vmem>>, vector<2x16xf32>
    %1 = arith.truncf %0 : vector<2x16xf32> to vector<2x16xbf16>
    %c0_1 = arith.constant 0 : index
    %c0_2 = arith.constant 0 : index
    %2 = vector.load %arg2[%c0_1, %c0_2] : memref<16x128xbf16, #tpu.memory_space<vmem>>, vector<16x128xbf16>
    %cst = arith.constant dense<0.000000e+00> : vector<2x128xf32>
    %3 = tpu.matmul %1, %2, %cst {dimension_numbers = #tpu.dot_dimension_numbers<[1], [0], [0], [1], [0, 0, 1, 1], [], []>} : vector<2x16xbf16>, vector<16x128xbf16>, vector<2x128xf32> -> vector<2x128xf32>
    %c0_3 = arith.constant 0 : index
    %c0_4 = arith.constant 0 : index
    %4 = vector.load %arg5[%c0_3, %c0_4] : memref<3x128xf32, #tpu.memory_space<vmem>>, vector<1x128xf32>
    %5 = vector.broadcast %4 : vector<1x128xf32> to vector<2x128xf32>
    %6 = arith.addf %3, %5 : vector<2x128xf32>
    %cst_5 = arith.constant 0.000000e+00 : f32
    %7 = vector.broadcast %cst_5 : f32 to vector<2x128xf32>
    %8 = arith.maximumf %6, %7 : vector<2x128xf32>
    %9 = arith.truncf %8 : vector<2x128xf32> to vector<2x128xbf16>
    %c0_6 = arith.constant 0 : index
    %c0_7 = arith.constant 0 : index
    %10 = vector.load %arg3[%c0_6, %c0_7] : memref<128x128xbf16, #tpu.memory_space<vmem>>, vector<128x128xbf16>
    %cst_8 = arith.constant dense<0.000000e+00> : vector<2x128xf32>
    %11 = tpu.matmul %9, %10, %cst_8 {dimension_numbers = #tpu.dot_dimension_numbers<[1], [0], [0], [1], [0, 0, 1, 1], [], []>} : vector<2x128xbf16>, vector<128x128xbf16>, vector<2x128xf32> -> vector<2x128xf32>
    %c1 = arith.constant 1 : index
    %c0_9 = arith.constant 0 : index
    %12 = vector.load %arg5[%c1, %c0_9] : memref<3x128xf32, #tpu.memory_space<vmem>>, vector<1x128xf32>
    %13 = vector.broadcast %12 : vector<1x128xf32> to vector<2x128xf32>
    %14 = arith.addf %11, %13 : vector<2x128xf32>
    %cst_10 = arith.constant 0.000000e+00 : f32
    %15 = vector.broadcast %cst_10 : f32 to vector<2x128xf32>
    %16 = arith.maximumf %14, %15 : vector<2x128xf32>
    %17 = arith.truncf %16 : vector<2x128xf32> to vector<2x128xbf16>
    %c0_11 = arith.constant 0 : index
    %c0_12 = arith.constant 0 : index
    %18 = vector.load %arg4[%c0_11, %c0_12] : memref<128x8xbf16, #tpu.memory_space<vmem>>, vector<128x8xbf16>
    %cst_13 = arith.constant dense<0.000000e+00> : vector<2x8xf32>
    %19 = tpu.matmul %17, %18, %cst_13 {dimension_numbers = #tpu.dot_dimension_numbers<[1], [0], [0], [1], [0, 0, 1, 1], [], []>} : vector<2x128xbf16>, vector<128x8xbf16>, vector<2x8xf32> -> vector<2x8xf32>
    %c2 = arith.constant 2 : index
    %c0_14 = arith.constant 0 : index
    %20 = vector.load %arg5[%c2, %c0_14] : memref<3x128xf32, #tpu.memory_space<vmem>>, vector<1x8xf32>
    %21 = vector.broadcast %20 : vector<1x8xf32> to vector<2x8xf32>
    %22 = arith.addf %19, %21 : vector<2x8xf32>
    %c0_15 = arith.constant 0 : index
    %c0_16 = arith.constant 0 : index
    %23 = vector.load %arg6[%c0_15, %c0_16] : memref<2x8xf32, #tpu.memory_space<vmem>>, vector<2x8xf32>
    tpu.vector_store %arg6[%c0_15, %c0_16], %22 {strides = array<i32>} : memref<2x8xf32, #tpu.memory_space<vmem>>, vector<2x8xf32>,
    return
  }
  func.func @transform_0(%arg0: i32) -> (i32, i32) {
    %c0_i32 = arith.constant 0 : i32
    %c0_i32_0 = arith.constant 0 : i32
    return %arg0, %c0_i32 : i32, i32
  }
  func.func @transform_1(%arg0: i32) -> (i32, i32) {
    %c0_i32 = arith.constant 0 : i32
    %c0_i32_0 = arith.constant 0 : i32
    %c0_i32_1 = arith.constant 0 : i32
    return %c0_i32, %c0_i32_0 : i32, i32
  }
  func.func @transform_2(%arg0: i32) -> (i32, i32) {
    %c0_i32 = arith.constant 0 : i32
    %c0_i32_0 = arith.constant 0 : i32
    %c0_i32_1 = arith.constant 0 : i32
    return %c0_i32, %c0_i32_0 : i32, i32
  }
  func.func @transform_3(%arg0: i32) -> (i32, i32) {
    %c0_i32 = arith.constant 0 : i32
    %c0_i32_0 = arith.constant 0 : i32
    %c0_i32_1 = arith.constant 0 : i32
    return %c0_i32, %c0_i32_0 : i32, i32
  }
  func.func @transform_4(%arg0: i32) -> (i32, i32) {
    %c0_i32 = arith.constant 0 : i32
    %c0_i32_0 = arith.constant 0 : i32
    %c0_i32_1 = arith.constant 0 : i32
    return %c0_i32, %c0_i32_0 : i32, i32
  }
  func.func @transform_5(%arg0: i32) -> (i32, i32) {
    %c0_i32 = arith.constant 0 : i32
    %c0_i32_0 = arith.constant 0 : i32
    return %arg0, %c0_i32 : i32, i32
  }
}

</mosaic_0001>

<bundles_post_ra>
// kernel: tpu_custom_call.1
= control target key start
LH: loop header
LB: loop body
LE: loop exit
PB: predicated region body
PF: predicated region fallthrough
CT: control target
= control target key end

     0   :  { %10 = vsyncpa [#allocation3], 0  ;;  %s647_s0 = inlined_call_operand.hbm [shape: f32[2,16], index: 0, kind: input, shape index: {}]   ;;  %s648_s1 = inlined_call_operand.hbm [shape: bf16[16,128], index: 1, kind: input, shape index: {}]   ;;  %s649_s2 = inlined_call_operand.vmem [shape: bf16[128,128], index: 2, kind: input, shape index: {}]   ;;  %s650_s3 = inlined_call_operand.vmem [shape: bf16[128,8], index: 3, kind: input, shape index: {}]   ;;  %s651_s4 = inlined_call_operand.vmem [shape: f32[3,128], index: 4, kind: input, shape index: {}]   ;;  %s652_s5 = inlined_call_operand.hbm [shape: f32[2,8], index: 5, kind: output, shape index: {}]  }
   0x1   :  { %11 = vsyncpa [#allocation6], 0 }
   0x2   :  { %12 = vsyncpa [#allocation4], 0  ;;  %s524_s18 = smov [#allocation2]   ;;  %s525_s20 = smov [#allocation5]  }
   0x3   :  { %s19_s19 = sshll.u32 %s524_s18, 4  ;;  %s28_s21 = sshll.u32 %s525_s20, 4  ;;  %s20_s19 = int_to_ptr.vmem [resolvable:$true] %s19_s19  ;;  %s29_s21 = int_to_ptr.vmem [resolvable:$true] %s28_s21 }
   0x4   :  { %s466_s22 = scalar_lea.vmem %s20_s19, 32  ;;  %p471_p1 = scmp.lt.s32.totalorder %s20_s19, %s20_s19 }
   0x5   :  { %p467_p0 = scmp.ne.s32.totalorder %s20_s19, %s466_s22  ;;  %p472_p2 = scmp.lt.s32.totalorder %s466_s22, %s466_s22 }
   0x7   :  { %p473_p3 = por %p472_p2, %p471_p1 }
   0x9   :  { %p474_p4 = pnand %p473_p3, %p467_p0 }
   0xb   :  { %477 = shalt.err (!%p474_p4)
}
   0xc   :  { %22 = dma.hbm_to_vmem [thread:$0]  %s647_s0, 32, %s20_s19, [#allocation3]  }
   0xd   :  { %s486_s25 = scalar_lea.vmem %s29_s21, 128  ;;  %p491_p6 = scmp.lt.s32.totalorder %s29_s21, %s29_s21 }
   0xe   :  { %p487_p5 = scmp.ne.s32.totalorder %s29_s21, %s486_s25  ;;  %p492_p7 = scmp.lt.s32.totalorder %s486_s25, %s486_s25 }
  0x10   :  { %p493_p8 = por %p492_p7, %p491_p6 }
  0x12   :  { %p494_p9 = pnand %p493_p8, %p487_p5 }
  0x14   :  { %497 = shalt.err (!%p494_p9)
}
  0x15   :  { %s526_s26 = smov 64   ;;  %s527_s27 = smov 4  }
  0x16   :  { %34 = dma.hbm_to_vmem [thread:$0]  %s648_s1, 128, %s29_s21, [#allocation6], %s526_s26, %s526_s26, %s527_s27  }
  0x17   :  { %518 = dma.done.wait [#allocation3], 32  }
  0x18   :  { %519 = vsyncadd [#allocation3], 4294967264 }
  0x19   :  { %520 = dma.done.wait [#allocation6], 128  }
  0x1a   :  { %521 = vsyncadd [#allocation6], 4294967168  ;;  %v528_v0 = vmov 0.0   ;;  %vm529_vm0 = vmmov 0   ;;  %v441_v1 = vld [vmem:[#allocation5] sm:$0xff]   ;;  %vm63_vm1 = vcmask 130048  }
  0x1b   :  { %388 = vmatprep.subr.bf16.mxu0 %v528_v0  ;;  %390 = vmatprep.mubr.msk.bf16.mxu0 %vm529_vm0, %v528_v0  ;;  %v48_v2 = vld [vmem:[#allocation2] sm:$0x3]  ;;  %v442_v4 = vld [vmem:[%s649_s2 + $0x38] sm:$0xff]   ;;  %v443_v5 = vld [vmem:[%s649_s2 + $0x30] sm:$0xff]   ;;  %s530_s13 = smov [#allocation7]   ;;  %vm329_vm2 = vcmask 58368  }
  0x1c   :  { %394 = vmatprep.subr.bf16.mxu1 %v528_v0  ;;  %410 = vmatprep.mubr.msk.bf16.mxu1 %vm529_vm0, %v528_v0  ;;  %v49_v3 = vpack.c.bf16 %v48_v2, %v48_v2  ;;  %v444_v6 = vld [vmem:[%s649_s2 + $0x28] sm:$0xff]   ;;  %v445_v7 = vld [vmem:[%s649_s2 + $0x20] sm:$0xff]   ;;  %v446_v8 = vld [vmem:[%s649_s2 + $0x18] sm:$0xff]   ;;  %s337_s14 = sshll.u32 %s530_s13, 4  ;;  %s338_s14 = int_to_ptr.vmem [resolvable:$true] %s337_s14 }
  0x1d   :  { %389 = vmatpush3.bf16.msra.mxu0 %v441_v1  ;;  %395 = vmatpush3.bf16.msra.mxu1 %v442_v4  ;;  %v447_v9 = vld [vmem:[%s649_s2 + $0x10] sm:$0xff]   ;;  %v448_v10 = vld [vmem:[%s649_s2 + $0x8] sm:$0xff]   ;;  %v449_v11 = vld [vmem:[%s649_s2] sm:$0xff]   ;;  %p503_p11 = scmp.lt.s32.totalorder %s338_s14, %s338_s14 }
  0x1e   :  { %414 = vmatprep.subr.bf16.mxu0 %v528_v0  ;;  %396 = vmatprep.subr.bf16.mxu1 %v528_v0  ;;  %v450_v12 = vld [vmem:[%s650_s3 + $0x38] sm:$0xff]   ;;  %v451_v13 = vld [vmem:[%s650_s3 + $0x30] sm:$0xff]   ;;  %v452_v14 = vld [vmem:[%s650_s3 + $0x28] sm:$0xff]  }
  0x1f   :  { %v453_v15 = vld [vmem:[%s650_s3 + $0x20] sm:$0xff]   ;;  %v454_v16 = vld [vmem:[%s650_s3 + $0x18] sm:$0xff]   ;;  %v455_v17 = vld [vmem:[%s650_s3 + $0x10] sm:$0xff]  }
  0x20   :  { %391 = vmatmul.mubr.msk.bf16.vlgmr.msra.gmra.mxu0 %vm63_vm1, %v49_v3  ;;  %v347_v18 = vld [vmem:[%s651_s4] ss:$0 sm:$0xff]  ;;  %v456_v26 = vld [vmem:[%s650_s3 + $0x8] sm:$0xff]   ;;  %v350_v28 = vld [vmem:[%s651_s4 + $0x1] ss:$0 sm:$0xff] }
  0x21   :  { %430 = vmatprep.mubr.msk.bf16.mxu0 %vm529_vm0, %v528_v0  ;;  %397 = vmatpush3.bf16.msra.mxu1 %v443_v5  ;;  %v457_v27 = vld [vmem:[%s650_s3] sm:$0xff]   ;;  %s498_s3 = scalar_lea.vmem %s338_s14, 32 }
  0x22   :  { %398 = vmatprep.subr.bf16.mxu1 %v528_v0  ;;  %415 = vmatpush3.bf16.msra.mxu0 %v450_v12  ;;  %v359_v36 = vld [vmem:[%s651_s4 + $0x2] ss:$0 sm:$0xff]  ;;  %p499_p10 = scmp.ne.s32.totalorder %s338_s14, %s498_s3  ;;  %p504_p12 = scmp.lt.s32.totalorder %s498_s3, %s498_s3 }
  0x23   :  { %416 = vmatprep.subr.bf16.mxu0 %v528_v0 }
  0x24   :  { %p505_p13 = por %p504_p12, %p503_p11 }
  0x25   :  { %399 = vmatpush3.bf16.msra.mxu1 %v444_v6 }
  0x26   :  { %400 = vmatprep.subr.bf16.mxu1 %v528_v0  ;;  %417 = vmatpush3.bf16.msra.mxu0 %v451_v13  ;;  %p506_p0 = pnand %p505_p13, %p499_p10 }
  0x27   :  { %418 = vmatprep.subr.bf16.mxu0 %v528_v0 }
  0x29   :  { %401 = vmatpush3.bf16.msra.mxu1 %v445_v7 }
  0x2a   :  { %402 = vmatprep.subr.bf16.mxu1 %v528_v0  ;;  %419 = vmatpush3.bf16.msra.mxu0 %v452_v14 }
  0x2b   :  { %420 = vmatprep.subr.bf16.mxu0 %v528_v0 }
  0x2d   :  { %403 = vmatpush3.bf16.msra.mxu1 %v446_v8 }
  0x2e   :  { %404 = vmatprep.subr.bf16.mxu1 %v528_v0  ;;  %421 = vmatpush3.bf16.msra.mxu0 %v453_v15 }
  0x2f   :  { %422 = vmatprep.subr.bf16.mxu0 %v528_v0 }
  0x31   :  { %405 = vmatpush3.bf16.msra.mxu1 %v447_v9 }
  0x32   :  { %406 = vmatprep.subr.bf16.mxu1 %v528_v0  ;;  %423 = vmatpush3.bf16.msra.mxu0 %v454_v16 }
  0x33   :  { %424 = vmatprep.subr.bf16.mxu0 %v528_v0 }
  0x35   :  { %407 = vmatpush3.bf16.msra.mxu1 %v448_v10 }
  0x36   :  { %408 = vmatprep.subr.bf16.mxu1 %v528_v0  ;;  %425 = vmatpush3.bf16.msra.mxu0 %v455_v17 }
  0x37   :  { %426 = vmatprep.subr.bf16.mxu0 %v528_v0 }
  0x39   :  { %409 = vmatpush3.bf16.msra.mxu1 %v449_v11 }
  0x3a   :  { %427 = vmatpush3.bf16.msra.mxu0 %v456_v26 }
  0x3b   :  { %428 = vmatprep.subr.bf16.mxu0 %v528_v0 }
  0x3e   :  { %429 = vmatpush3.bf16.msra.mxu0 %v457_v27 }
  0xe0   :  { %v101_v19 = vpop.f32.mrf.mxu0 }
  0xe1   :  { %v102_v20 = vadd.f32 %v347_v18, %v101_v19 }
  0xe2   :  { %v392_v21 = vpop.f32.mrf.mxu0 }
  0xe3   :  { %v107_v22 = vmax.f32 %v102_v20, 0.0 }
  0xe4   :  { %v104_v23 = vpop.f32.mrf.mxu0 }
  0xe5   :  { %v108_v24 = vpack.c.bf16 %v107_v22, %v107_v22 }
  0xe6   :  { %v393_v25 = vpop.f32.mrf.mxu0 }
  0xe7   :  { %411 = vmatmul.mubr.bf16.vlgmr.msra.gmra.mxu1 %v108_v24 }
 0x1a7   :  { %v212_v29 = vpop.f32.mrf.mxu1 }
 0x1a8   :  { %v213_v30 = vadd.f32 %v350_v28, %v212_v29 }
 0x1a9   :  { %v412_v31 = vpop.f32.mrf.mxu1 }
 0x1aa   :  { %v218_v32 = vmax.f32 %v213_v30, 0.0 }
 0x1ab   :  { %v215_v33 = vpop.f32.mrf.mxu1 }
 0x1ac   :  { %v219_v34 = vpack.c.bf16 %v218_v32, %v218_v32 }
 0x1ad   :  { %v413_v35 = vpop.f32.mrf.mxu1 }
 0x1ae   :  { %431 = vmatmul.mubr.bf16.vlgmr.msra.gmra.mxu0 %v219_v34 }
 0x26e   :  { %v323_v37 = vpop.f32.mrf.mxu0 }
 0x26f   :  { %v324_v38 = vadd.f32 %v359_v36, %v323_v37 }
 0x270   :  { %v432_v39 = vpop.f32.mrf.mxu0 }
 0x271   :  { %330 = vst.msk [vmem:[#allocation7] sm:$0x3] %vm329_vm2, %v324_v38 }
 0x272   :  { %v326_v40 = vpop.f32.mrf.mxu0 }
 0x273   :  { %509 = shalt.err (!%p506_p0)
}
 0x274   :  { %340 = dma.vmem_to_hbm [thread:$0]  %s338_s14, 32, %s652_s5, [#allocation4]   ;;  %v433_v41 = vpop.f32.mrf.mxu0 }
 0x275   :  { %522 = dma.done.wait [#allocation4], 32  }
 0x276   :  { %523 = vsyncadd [#allocation4], 4294967264 }
 0x277   :  { %344 = vsyncpa [#allocation3], 1 }
 0x278   :  { %345 = vsyncpa [#allocation6], 1 }
 0x279   :  { %346 = vsyncpa [#allocation4], 1 }

</bundles_post_ra>
